<compile_context>
chip_gen: v6e
topology: v6e:2x2x1
jax: 0.10.0
libtpu: 0.0.40
codegen_flags: <defaults>
</compile_context>

<pallas_src>
import functools

import jax
import jax.numpy as jnp
from jax.experimental import pallas as pl
from jax.experimental.pallas import tpu as pltpu


def _basic_block_kernel(x_ref, w_ref, b_ref, m_ref, a_ref, o_ref,
                        *, H, W, Cin, Cout, Nb):
    """One batch block of Nb images.

    x_ref: (Nb, Cin, H*W)   input, spatial flattened into lanes (compute dtype)
    w_ref: (Cout, 9*Cin)    im2col-packed conv weights (compute dtype)
    b_ref: (Cout, 1)        conv bias, f32
    m_ref: (9*Cin, H*W)     pre-expanded per-tap validity masks (compute dtype)
    a_ref: (1, 1) [SMEM]    PReLU slope (single shared parameter), f32
    o_ref: (Nb, Cout, H*W)  output (input dtype)
    """
    HW = H * W

    # Hoisted loop-invariants (JAX does not CSE broadcasts inside loops).
    w = w_ref[...]                                        # (Cout, 9*Cin)
    mask = m_ref[...]                                     # (9*Cin, HW)
    bias = jnp.broadcast_to(b_ref[...], (Cout, HW))       # (Cout, HW), f32
    alpha = a_ref[0, 0]                                   # f32 scalar from SMEM

    for n in range(Nb):                                   # static unroll, Nb small
        x = x_ref[n]                                      # (Cin, HW)

        # im2col as a register value: each of the 9 taps is a circular lane
        # roll (XLU slot) of the flattened image; wrapped / out-of-bounds
        # lanes are zeroed by the pre-expanded mask in a single multiply.
        taps = []
        for tap in range(9):
            dh, dw = tap // 3 - 1, tap % 3 - 1
            s = dh * W + dw                               # out[p] = x[p + s]
            taps.append(x if s == 0 else pltpu.roll(x, shift=(-s) % HW, axis=1))
        xcol = jnp.concatenate(taps, axis=0) * mask       # (9*Cin, HW)

        # Whole 3x3 conv as one MXU matmul, f32 accumulation.
        acc = jnp.dot(w, xcol, preferred_element_type=jnp.float32)   # (Cout, HW)
        acc = acc + bias
        y = jnp.where(acc > 0, acc, alpha * acc)          # PReLU (shared alpha)
        o_ref[n] = y.astype(o_ref.dtype)


def basic_block(x_nchw, weight_oihw, bias, alpha, *,
                num_batch_blocks=None, compute_dtype=jnp.bfloat16):
    """BasicBlock.forward(x): conv3x3 (stride 1, pad 1) + PReLU, NCHW in/out."""
    N, Cin, H, W = x_nchw.shape
    Cout = weight_oihw.shape[0]
    HW = H * W

    if compute_dtype is None:
        compute_dtype = x_nchw.dtype
    if num_batch_blocks is None:
        # Keep >=2 grid steps when possible so both v7x TensorCores get work;
        # pass num_batch_blocks=1 on v5e/v6e to fold the whole batch into one
        # step and maximally amortize the per-step overhead.
        num_batch_blocks = 2 if (N % 2 == 0 and N >= 2) else 1
    assert N % num_batch_blocks == 0, "batch must divide evenly into blocks"
    Nb = N // num_batch_blocks

    # Free reshape: keep NCHW, flatten spatial into the lane axis.
    x_flat = x_nchw.reshape(N, Cin, HW).astype(compute_dtype)

    # One-time tiny parameter repacks (Cout*Cin*9 elements).
    # im2col row order is tap-major, channel-minor:
    #   row = (kh*3 + kw) * Cin + ci   <->   weight[co, ci, kh, kw]
    w_col = (jnp.transpose(weight_oihw, (0, 2, 3, 1))
             .reshape(Cout, 9 * Cin).astype(compute_dtype))
    b = bias.reshape(Cout, 1).astype(jnp.float32)
    a = jnp.asarray(alpha, jnp.float32).reshape(1, 1)
    # TODO(synk): per-channel PReLU (nn.PReLU(num_parameters=Cout)) would need
    # alpha as a (Cout, 1) VMEM block instead of an SMEM scalar.

    # Per-tap validity masks, pre-expanded to (9*Cin, HW) so the kernel applies
    # them with a single elementwise multiply (centre-tap rows are all ones).
    p = jnp.arange(HW, dtype=jnp.int32)
    hh, ww = p // W, p % W
    rows = []
    for tap in range(9):
        dh, dw = tap // 3 - 1, tap % 3 - 1
        rows.append((hh + dh >= 0) & (hh + dh < H) & (ww + dw >= 0) & (ww + dw < W))
    masks = jnp.repeat(jnp.stack(rows), Cin, axis=0).astype(compute_dtype)  # (9*Cin, HW)

    kernel = functools.partial(_basic_block_kernel,
                               H=H, W=W, Cin=Cin, Cout=Cout, Nb=Nb)

    out_flat = pl.pallas_call(
        kernel,
        out_shape=jax.ShapeDtypeStruct((N, Cout, HW), x_nchw.dtype),
        grid=(num_batch_blocks,),
        in_specs=[
            pl.BlockSpec((Nb, Cin, HW), lambda i: (i, 0, 0)),
            pl.BlockSpec((Cout, 9 * Cin), lambda i: (0, 0)),
            pl.BlockSpec((Cout, 1), lambda i: (0, 0)),
            pl.BlockSpec((9 * Cin, HW), lambda i: (0, 0)),
            pl.BlockSpec(memory_space=pltpu.MemorySpace.SMEM),  # PReLU alpha
        ],
        out_specs=pl.BlockSpec((Nb, Cout, HW), lambda i: (i, 0, 0)),
        compiler_params=pltpu.CompilerParams(dimension_semantics=("parallel",)),
    )(x_flat, w_col, b, masks, a)

    return out_flat.reshape(N, Cout, H, W)   # free reshape back to NCHW


def _reference(x_nchw, weight_oihw, bias, alpha):
    """Pure-JAX reference (lax conv) for correctness checking."""
    y = jax.lax.conv_general_dilated(
        x_nchw, weight_oihw,
        window_strides=(1, 1), padding=((1, 1), (1, 1)),
        dimension_numbers=("NCHW", "OIHW", "NCHW"),
    ) + bias.reshape(1, -1, 1, 1)
    return jnp.where(y > 0, y, alpha * y)


if __name__ == "__main__":
    # Small shapes consistent with BasicBlock(ins=4, outs=8).
    N, Cin, Cout, H, W = 2, 4, 8, 16, 16

    key = jax.random.PRNGKey(0)
    kx, kw, kb = jax.random.split(key, 3)

    x = jax.random.normal(kx, (N, Cin, H, W), dtype=jnp.float32)
    weight = jax.random.normal(kw, (Cout, Cin, 3, 3), dtype=jnp.float32) * 0.1
    bias = jax.random.normal(kb, (Cout,), dtype=jnp.float32) * 0.1
    alpha = jnp.asarray(0.25, dtype=jnp.float32)   # nn.PReLU() default init

    ref = _reference(x, weight, bias, alpha)

    # Exact-semantics path: f32 matmul, whole batch folded into one grid step
    # (exercises the Nb>1 batch-folding loop; ideal config on v5e/v6e).
    out_f32 = jax.block_until_ready(
        basic_block(x, weight, bias, alpha,
                    num_batch_blocks=1, compute_dtype=jnp.float32))
    assert out_f32.shape == (N, Cout, H, W)
    assert jnp.allclose(out_f32, ref, atol=1e-4, rtol=1e-4), "f32 path mismatch"

    # Default path: bf16 MXU operands with f32 accumulation, grid=(2,) so both
    # v7x TensorCores stay busy.
    out_bf16 = jax.block_until_ready(basic_block(x, weight, bias, alpha))
    assert out_bf16.shape == (N, Cout, H, W)
    assert jnp.allclose(out_bf16, ref, atol=3e-2, rtol=3e-2), "bf16 path mismatch"

    print("KERNEL_OK")
</pallas_src>

<mosaic_0001>
module attributes {stable_mosaic.version = 11 : i64} {
  func.func @_basic_block_kernel(%arg0: i32, %arg1: memref<2x4x256xf32, #tpu.memory_space<vmem>>, %arg2: memref<8x36xf32, #tpu.memory_space<vmem>>, %arg3: memref<8x1xf32, #tpu.memory_space<vmem>>, %arg4: memref<36x256xf32, #tpu.memory_space<vmem>>, %arg5: memref<1x1xf32, #tpu.memory_space<smem>>, %arg6: memref<2x8x256xf32, #tpu.memory_space<vmem>>) attributes {dimension_semantics = [#tpu.dimension_semantics<parallel>], iteration_bounds = array<i64: 1>, scalar_prefetch = 0 : i64, scratch_operands = 0 : i64, tpu.core_type = #tpu.core_type<tc>, window_params = [{transform_indices = @transform_0, window_bounds = array<i64: 2, 4, 256>}, {pipeline_mode = #tpu.pipeline_mode<synchronous>, transform_indices = @transform_1, window_bounds = array<i64: 8, 36>}, {pipeline_mode = #tpu.pipeline_mode<synchronous>, transform_indices = @transform_2, window_bounds = array<i64: 8, 1>}, {pipeline_mode = #tpu.pipeline_mode<synchronous>, transform_indices = @transform_3, window_bounds = array<i64: 36, 256>}, {transform_indices = @transform_4, window_bounds = array<i64: 1, 1>}, {transform_indices = @transform_5, window_bounds = array<i64: 2, 8, 256>}]} {
    %c0 = arith.constant 0 : index
    %c0_0 = arith.constant 0 : index
    %0 = vector.load %arg2[%c0, %c0_0] : memref<8x36xf32, #tpu.memory_space<vmem>>, vector<8x36xf32>
    %c0_1 = arith.constant 0 : index
    %c0_2 = arith.constant 0 : index
    %1 = vector.load %arg4[%c0_1, %c0_2] : memref<36x256xf32, #tpu.memory_space<vmem>>, vector<36x256xf32>
    %c0_3 = arith.constant 0 : index
    %c0_4 = arith.constant 0 : index
    %2 = vector.load %arg3[%c0_3, %c0_4] : memref<8x1xf32, #tpu.memory_space<vmem>>, vector<8x1xf32>
    %3 = vector.shape_cast %2 : vector<8x1xf32> to vector<8x1xf32>
    %4 = vector.broadcast %3 : vector<8x1xf32> to vector<8x256xf32>
    %c0_5 = arith.constant 0 : index
    %c0_6 = arith.constant 0 : index
    %5 = memref.load %arg5[%c0_5, %c0_6] : memref<1x1xf32, #tpu.memory_space<smem>>
    %c0_7 = arith.constant 0 : index
    %c0_8 = arith.constant 0 : index
    %c0_9 = arith.constant 0 : index
    %6 = vector.load %arg1[%c0_7, %c0_8, %c0_9] : memref<2x4x256xf32, #tpu.memory_space<vmem>>, vector<1x4x256xf32>
    %7 = vector.shape_cast %6 : vector<1x4x256xf32> to vector<4x256xf32>
    %c17_i32 = arith.constant 17 : i32
    %8 = tpu.dynamic_rotate %7 by %c17_i32 dim 1 : vector<4x256xf32>, i32 -> vector<4x256xf32>
    %c16_i32 = arith.constant 16 : i32
    %9 = tpu.dynamic_rotate %7 by %c16_i32 dim 1 : vector<4x256xf32>, i32 -> vector<4x256xf32>
    %c15_i32 = arith.constant 15 : i32
    %10 = tpu.dynamic_rotate %7 by %c15_i32 dim 1 : vector<4x256xf32>, i32 -> vector<4x256xf32>
    %c1_i32 = arith.constant 1 : i32
    %11 = tpu.dynamic_rotate %7 by %c1_i32 dim 1 : vector<4x256xf32>, i32 -> vector<4x256xf32>
    %c255_i32 = arith.constant 255 : i32
    %12 = tpu.dynamic_rotate %7 by %c255_i32 dim 1 : vector<4x256xf32>, i32 -> vector<4x256xf32>
    %c241_i32 = arith.constant 241 : i32
    %13 = tpu.dynamic_rotate %7 by %c241_i32 dim 1 : vector<4x256xf32>, i32 -> vector<4x256xf32>
    %c240_i32 = arith.constant 240 : i32
    %14 = tpu.dynamic_rotate %7 by %c240_i32 dim 1 : vector<4x256xf32>, i32 -> vector<4x256xf32>
    %c239_i32 = arith.constant 239 : i32
    %15 = tpu.dynamic_rotate %7 by %c239_i32 dim 1 : vector<4x256xf32>, i32 -> vector<4x256xf32>
    %16 = tpu.concatenate %8, %9, %10, %11, %7, %12, %13, %14, %15 in 0 : vector<4x256xf32>, vector<4x256xf32>, vector<4x256xf32>, vector<4x256xf32>, vector<4x256xf32>, vector<4x256xf32>, vector<4x256xf32>, vector<4x256xf32>, vector<4x256xf32> -> vector<36x256xf32>
    %17 = arith.mulf %16, %1 : vector<36x256xf32>
    %cst = arith.constant dense<0.000000e+00> : vector<8x256xf32>
    %18 = tpu.matmul %0, %17, %cst {dimension_numbers = #tpu.dot_dimension_numbers<[1], [0], [0], [1], [0, 0, 1, 1], [], []>} : vector<8x36xf32>, vector<36x256xf32>, vector<8x256xf32> -> vector<8x256xf32>
    %19 = arith.addf %18, %4 : vector<8x256xf32>
    %cst_10 = arith.constant 0.000000e+00 : f32
    %20 = vector.broadcast %cst_10 : f32 to vector<8x256xf32>
    %21 = arith.cmpf ogt, %19, %20 : vector<8x256xf32>
    %22 = vector.broadcast %5 : f32 to vector<8x256xf32>
    %23 = arith.mulf %22, %19 : vector<8x256xf32>
    %24 = arith.select %21, %19, %23 : vector<8x256xi1>, vector<8x256xf32>
    %c0_11 = arith.constant 0 : index
    %c0_12 = arith.constant 0 : index
    %c0_13 = arith.constant 0 : index
    %25 = vector.load %arg6[%c0_11, %c0_12, %c0_13] : memref<2x8x256xf32, #tpu.memory_space<vmem>>, vector<1x8x256xf32>
    %26 = vector.shape_cast %25 : vector<1x8x256xf32> to vector<8x256xf32>
    %27 = vector.shape_cast %24 : vector<8x256xf32> to vector<1x8x256xf32>
    tpu.vector_store %arg6[%c0_11, %c0_12, %c0_13], %27 {strides = array<i32>} : memref<2x8x256xf32, #tpu.memory_space<vmem>>, vector<1x8x256xf32>,
    %c1 = arith.constant 1 : index
    %c0_14 = arith.constant 0 : index
    %c0_15 = arith.constant 0 : index
    %28 = vector.load %arg1[%c1, %c0_14, %c0_15] : memref<2x4x256xf32, #tpu.memory_space<vmem>>, vector<1x4x256xf32>
    %29 = vector.shape_cast %28 : vector<1x4x256xf32> to vector<4x256xf32>
    %c17_i32_16 = arith.constant 17 : i32
    %30 = tpu.dynamic_rotate %29 by %c17_i32_16 dim 1 : vector<4x256xf32>, i32 -> vector<4x256xf32>
    %c16_i32_17 = arith.constant 16 : i32
    %31 = tpu.dynamic_rotate %29 by %c16_i32_17 dim 1 : vector<4x256xf32>, i32 -> vector<4x256xf32>
    %c15_i32_18 = arith.constant 15 : i32
    %32 = tpu.dynamic_rotate %29 by %c15_i32_18 dim 1 : vector<4x256xf32>, i32 -> vector<4x256xf32>
    %c1_i32_19 = arith.constant 1 : i32
    %33 = tpu.dynamic_rotate %29 by %c1_i32_19 dim 1 : vector<4x256xf32>, i32 -> vector<4x256xf32>
    %c255_i32_20 = arith.constant 255 : i32
    %34 = tpu.dynamic_rotate %29 by %c255_i32_20 dim 1 : vector<4x256xf32>, i32 -> vector<4x256xf32>
    %c241_i32_21 = arith.constant 241 : i32
    %35 = tpu.dynamic_rotate %29 by %c241_i32_21 dim 1 : vector<4x256xf32>, i32 -> vector<4x256xf32>
    %c240_i32_22 = arith.constant 240 : i32
    %36 = tpu.dynamic_rotate %29 by %c240_i32_22 dim 1 : vector<4x256xf32>, i32 -> vector<4x256xf32>
    %c239_i32_23 = arith.constant 239 : i32
    %37 = tpu.dynamic_rotate %29 by %c239_i32_23 dim 1 : vector<4x256xf32>, i32 -> vector<4x256xf32>
    %38 = tpu.concatenate %30, %31, %32, %33, %29, %34, %35, %36, %37 in 0 : vector<4x256xf32>, vector<4x256xf32>, vector<4x256xf32>, vector<4x256xf32>, vector<4x256xf32>, vector<4x256xf32>, vector<4x256xf32>, vector<4x256xf32>, vector<4x256xf32> -> vector<36x256xf32>
    %39 = arith.mulf %38, %1 : vector<36x256xf32>
    %cst_24 = arith.constant dense<0.000000e+00> : vector<8x256xf32>
    %40 = tpu.matmul %0, %39, %cst_24 {dimension_numbers = #tpu.dot_dimension_numbers<[1], [0], [0], [1], [0, 0, 1, 1], [], []>} : vector<8x36xf32>, vector<36x256xf32>, vector<8x256xf32> -> vector<8x256xf32>
    %41 = arith.addf %40, %4 : vector<8x256xf32>
    %cst_25 = arith.constant 0.000000e+00 : f32
    %42 = vector.broadcast %cst_25 : f32 to vector<8x256xf32>
    %43 = arith.cmpf ogt, %41, %42 : vector<8x256xf32>
    %44 = vector.broadcast %5 : f32 to vector<8x256xf32>
    %45 = arith.mulf %44, %41 : vector<8x256xf32>
    %46 = arith.select %43, %41, %45 : vector<8x256xi1>, vector<8x256xf32>
    %c1_26 = arith.constant 1 : index
    %c0_27 = arith.constant 0 : index
    %c0_28 = arith.constant 0 : index
    %47 = vector.load %arg6[%c1_26, %c0_27, %c0_28] : memref<2x8x256xf32, #tpu.memory_space<vmem>>, vector<1x8x256xf32>
    %48 = vector.shape_cast %47 : vector<1x8x256xf32> to vector<8x256xf32>
    %49 = vector.shape_cast %46 : vector<8x256xf32> to vector<1x8x256xf32>
    tpu.vector_store %arg6[%c1_26, %c0_27, %c0_28], %49 {strides = array<i32>} : memref<2x8x256xf32, #tpu.memory_space<vmem>>, vector<1x8x256xf32>,
    return
  }
  func.func @transform_0(%arg0: i32) -> (i32, i32, i32) {
    %c0_i32 = arith.constant 0 : i32
    %c0_i32_0 = arith.constant 0 : i32
    %c0_i32_1 = arith.constant 0 : i32
    return %arg0, %c0_i32, %c0_i32_0 : i32, i32, i32
  }
  func.func @transform_1(%arg0: i32) -> (i32, i32) {
    %c0_i32 = arith.constant 0 : i32
    %c0_i32_0 = arith.constant 0 : i32
    %c0_i32_1 = arith.constant 0 : i32
    return %c0_i32, %c0_i32_0 : i32, i32
  }
  func.func @transform_2(%arg0: i32) -> (i32, i32) {
    %c0_i32 = arith.constant 0 : i32
    %c0_i32_0 = arith.constant 0 : i32
    %c0_i32_1 = arith.constant 0 : i32
    return %c0_i32, %c0_i32_0 : i32, i32
  }
  func.func @transform_3(%arg0: i32) -> (i32, i32) {
    %c0_i32 = arith.constant 0 : i32
    %c0_i32_0 = arith.constant 0 : i32
    %c0_i32_1 = arith.constant 0 : i32
    return %c0_i32, %c0_i32_0 : i32, i32
  }
  func.func @transform_4(%arg0: i32) -> (i32, i32) {
    %c0_i32 = arith.constant 0 : i32
    %c0_i32_0 = arith.constant 0 : i32
    %c0_i32_1 = arith.constant 0 : i32
    return %c0_i32, %c0_i32_0 : i32, i32
  }
  func.func @transform_5(%arg0: i32) -> (i32, i32, i32) {
    %c0_i32 = arith.constant 0 : i32
    %c0_i32_0 = arith.constant 0 : i32
    %c0_i32_1 = arith.constant 0 : i32
    return %arg0, %c0_i32, %c0_i32_0 : i32, i32, i32
  }
}

</mosaic_0001>

<bundles_post_ra>
// kernel: tpu_custom_call.1
= control target key start
LH: loop header
LB: loop body
LE: loop exit
PB: predicated region body
PF: predicated region fallthrough
CT: control target
= control target key end

     0   :  { %11 = vsyncpa [#allocation4], 0  ;;  %s761_s0 = inlined_call_operand.hbm [shape: f32[2,4,256], index: 0, kind: input, shape index: {}]   ;;  %s762_s1 = inlined_call_operand.vmem [shape: f32[8,36], index: 1, kind: input, shape index: {}]   ;;  %s763_s2 = inlined_call_operand.vmem [shape: f32[8,1], index: 2, kind: input, shape index: {}]   ;;  %s764_s3 = inlined_call_operand.hbm [shape: f32[36,256], index: 3, kind: input, shape index: {}]   ;;  %s765_s4 = inlined_call_operand.<no memory space> [shape: f32[1,1], index: 4, kind: input, shape index: {}]   ;;  %s766_s5 = inlined_call_operand.hbm [shape: f32[2,8,256], index: 5, kind: output, shape index: {}]  }
   0x1   :  { %12 = vsyncpa [#allocation7], 0 }
   0x2   :  { %13 = vsyncpa [#allocation5], 0  ;;  %s553_s18 = smov [#allocation3]  }
   0x3   :  { %s19_s19 = sshll.u32 %s553_s18, 4  ;;  %s20_s19 = int_to_ptr.vmem [resolvable:$true] %s19_s19 }
   0x4   :  { %s495_s20 = scalar_lea.vmem %s20_s19, 256  ;;  %p500_p1 = scmp.lt.s32.totalorder %s20_s19, %s20_s19 }
   0x5   :  { %p496_p0 = scmp.ne.s32.totalorder %s20_s19, %s495_s20  ;;  %p501_p2 = scmp.lt.s32.totalorder %s495_s20, %s495_s20 }
   0x7   :  { %p502_p3 = por %p501_p2, %p500_p1 }
   0x9   :  { %p503_p4 = pnand %p502_p3, %p496_p0 }
   0xb   :  { %506 = shalt.err (!%p503_p4)
}
   0xc   :  { %s554_s21 = smov 128   ;;  %s555_s22 = smov 8  }
   0xd   :  { %25 = dma.hbm_to_vmem [thread:$0]  %s761_s0, 256, %s20_s19, [#allocation4], %s554_s21, %s554_s21, %s555_s22  }
   0xe   :  { %s556_s25 = smov [#allocation6]  }
   0xf   :  { %s35_s26 = sshll.u32 %s556_s25, 4  ;;  %s36_s26 = int_to_ptr.vmem [resolvable:$true] %s35_s26 }
  0x10   :  { %s515_s27 = scalar_lea.vmem %s36_s26, 1280  ;;  %p520_p6 = scmp.lt.s32.totalorder %s36_s26, %s36_s26 }
  0x11   :  { %p516_p5 = scmp.ne.s32.totalorder %s36_s26, %s515_s27  ;;  %p521_p7 = scmp.lt.s32.totalorder %s515_s27, %s515_s27 }
  0x13   :  { %p522_p8 = por %p521_p7, %p520_p6 }
  0x15   :  { %p523_p9 = pnand %p522_p8, %p516_p5 }
  0x17   :  { %526 = shalt.err (!%p523_p9)
}
  0x18   :  { %s557_s28 = smov 256   ;;  %s558_s29 = smov 16  }
  0x19   :  { %41 = dma.hbm_to_vmem [thread:$0]  %s764_s3, 1280, %s36_s26, [#allocation7], %s557_s28, %s557_s28, %s558_s29  }
  0x1a   :  { %547 = dma.done.wait [#allocation4], 256  }
  0x1b   :  { %548 = vsyncadd [#allocation4], 4294967040 }
  0x1c   :  { %549 = dma.done.wait [#allocation7], 1280  }
  0x1d   :  { %550 = vsyncadd [#allocation7], 4294966016  ;;  %v608_v0 = vld [vmem:[#allocation3 + $0x8] sm:$0xff]  ;;  %v610_v1 = vld [vmem:[#allocation3] sm:$0xff]  ;;  %s559_s0 = smov 112   ;;  %s560_s3 = smov 111   ;;  %v76_v9 = vlaneseq }
  0x1e   :  { %304 = vrot.lane.b32.xlu1 %v608_v0, %s559_s0  ;;  %116 = vrot.lane.b32.xlu0 %v610_v1, %s559_s0  ;;  %v616_v2 = vcombine.high %v608_v0, %v608_v0  ;;  %v622_v3 = vcombine.high %v610_v1, %v610_v1  ;;  %s561_s7 = smov 127   ;;  %s562_s8 = smov 113   ;;  %v565_v4 = vmov 0.0   ;;  %v566_v5 = vmov 0   ;;  %v61_v6 = vld [vmem:[%s763_s2] sm:$0xff]  ;;  %v58_v39 = vld [vmem:[#allocation6 + $0x38] sm:$0xff] }
  0x1f   :  { %s563_s9 = smov 1   ;;  %s564_s10 = smov 15   ;;  %247 = vmatprep.mubr.f32.mxu0 %v565_v4  ;;  %428 = vmatprep.mubr.f32.mxu1 %v565_v4  ;;  %v659_v10 = vand.u32 127, %v76_v9  ;;  %v59_v13 = vld [vmem:[#allocation6 + $0x40] sm:$0xf]  ;;  %vm154_vm1 = vcmask 1043456  }
  0x20   :  { %484 = vset.pattern.permute.xlu0 %v566_v5  ;;  %s567_s11 = smov 17   ;;  %v60_v14 = vld [vmem:[#allocation6 + $0x48] sm:$0xf]  ;;  %v57_v40 = vld [vmem:[#allocation6 + $0x30] sm:$0xff]  ;;  %v55_v49 = vld [vmem:[#allocation6 + $0x20] sm:$0xff]  ;;  %vm173_vm9 = vcmask 293888  }
  0x21   :  { %vm127_vm0 = vcmp.lt.s32.totalorder %v659_v10, 111  ;;  %vm106_vm2 = vcmp.lt.s32.totalorder %v659_v10, 127  ;;  %vm120_vm3 = vcmp.lt.s32.totalorder %v659_v10, 112  ;;  %vm113_vm4 = vcmp.lt.s32.totalorder %v659_v10, 113  ;;  %v56_v45 = vld [vmem:[#allocation6 + $0x28] sm:$0xff]  ;;  %s568_s16 = smov [#allocation8]  }
  0x22   :  { %306 = vrot.lane.b32.xlu1 %v616_v2, %s559_s0  ;;  %123 = vrot.lane.b32.xlu0 %v610_v1, %s560_s3  ;;  %vm99_vm5 = vcmp.lt.s32.totalorder %v659_v10, 1  ;;  %vm92_vm6 = vcmp.lt.s32.totalorder %v659_v10, 15  ;;  %vm85_vm7 = vcmp.lt.s32.totalorder %v659_v10, 16  ;;  %vm78_vm8 = vcmp.lt.s32.totalorder %v659_v10, 17  ;;  %s449_s17 = sshll.u32 %s568_s16, 4  ;;  %s450_s17 = int_to_ptr.vmem [resolvable:$true] %s449_s17 }
  0x23   :  { %p532_p11 = scmp.lt.s32.totalorder %s450_s17, %s450_s17 }
  0x26   :  { %125 = vrot.lane.b32.xlu1 %v622_v3, %s560_s3  ;;  %118 = vrot.lane.b32.xlu0 %v622_v3, %s559_s0 }
  0x2a   :  { %312 = vrot.lane.b32.xlu1 %v616_v2, %s560_s3  ;;  %310 = vrot.lane.b32.xlu0 %v608_v0, %s560_s3 }
  0x2e   :  { %104 = vrot.lane.b32.xlu1 %v622_v3, %s561_s7  ;;  %102 = vrot.lane.b32.xlu0 %v610_v1, %s561_s7 }
  0x32   :  { %111 = vrot.lane.b32.xlu1 %v622_v3, %s562_s8  ;;  %109 = vrot.lane.b32.xlu0 %v610_v1, %s562_s8 }
  0x36   :  { %294 = vrot.lane.b32.xlu1 %v616_v2, %s561_s7  ;;  %292 = vrot.lane.b32.xlu0 %v608_v0, %s561_s7 }
  0x3a   :  { %300 = vrot.lane.b32.xlu1 %v616_v2, %s562_s8  ;;  %298 = vrot.lane.b32.xlu0 %v608_v0, %s562_s8 }
  0x3e   :  { %97 = vrot.lane.b32.xlu1 %v622_v3, %s563_s9  ;;  %95 = vrot.lane.b32.xlu0 %v610_v1, %s563_s9 }
  0x42   :  { %288 = vrot.lane.b32.xlu1 %v616_v2, %s563_s9  ;;  %286 = vrot.lane.b32.xlu0 %v608_v0, %s563_s9 }
  0x46   :  { %83 = vrot.lane.b32.xlu1 %v622_v3, %s558_s29  ;;  %81 = vrot.lane.b32.xlu0 %v610_v1, %s558_s29 }
  0x4a   :  { %90 = vrot.lane.b32.xlu1 %v622_v3, %s564_s10  ;;  %88 = vrot.lane.b32.xlu0 %v610_v1, %s564_s10 }
  0x4e   :  { %276 = vrot.lane.b32.xlu1 %v616_v2, %s558_s29  ;;  %274 = vrot.lane.b32.xlu0 %v608_v0, %s558_s29 }
  0x52   :  { %282 = vrot.lane.b32.xlu1 %v616_v2, %s564_s10  ;;  %280 = vrot.lane.b32.xlu0 %v608_v0, %s564_s10 }
  0x56   :  { %74 = vrot.lane.b32.xlu1 %v622_v3, %s567_s11  ;;  %72 = vrot.lane.b32.xlu0 %v610_v1, %s567_s11 }
  0x5a   :  { %270 = vrot.lane.b32.xlu1 %v616_v2, %s567_s11  ;;  %268 = vrot.lane.b32.xlu0 %v608_v0, %s567_s11 }
  0x5e   :  { %64 = vperm.xlu0 %484, %v61_v6  }
  0x90   :  { %v305_v7 = vpop.permute.xlu1 %304  ;;  %v117_v8 = vpop.permute.xlu0 %116 }
  0x94   :  { %v307_v11 = vpop.permute.xlu1 %306  ;;  %v124_v12 = vpop.permute.xlu0 %123 }
  0x95   :  { %v308_v51 = vsel %vm120_vm3, %v305_v7, %v307_v11  ;;  %v309_v54 = vsel %vm120_vm3, %v307_v11, %v305_v7 }
  0x96   :  { %v336_v61 = vrot.slane %v308_v51, 4  ;;  %v337_v62 = vrot.slane %v309_v54, 4 }
  0x98   :  { %v126_v15 = vpop.permute.xlu1 %125  ;;  %v119_v16 = vpop.permute.xlu0 %118 }
  0x99   :  { %v128_v17 = vsel %vm127_vm0, %v124_v12, %v126_v15  ;;  %v129_v18 = vsel %vm127_vm0, %v126_v15, %v124_v12  ;;  %v121_v29 = vsel %vm120_vm3, %v117_v8, %v119_v16  ;;  %v122_v30 = vsel %vm120_vm3, %v119_v16, %v117_v8 }
  0x9a   :  { %v171_v19 = vmul.f32 %v128_v17, %v59_v13  ;;  %v172_v20 = vmul.f32 %v129_v18, %v60_v14  ;;  %v150_v35 = vrot.slane %v121_v29, 4  ;;  %v151_v36 = vrot.slane %v122_v30, 4 }
  0x9c   :  { %v313_v21 = vpop.permute.xlu1 %312  ;;  %v311_v22 = vpop.permute.xlu0 %310  ;;  %462 = vmatprep.subr.msk.mxu0 %vm154_vm1, %v172_v20 }
  0x9d   :  { %v314_v23 = vsel %vm127_vm0, %v311_v22, %v313_v21  ;;  %v315_v24 = vsel %vm127_vm0, %v313_v21, %v311_v22  ;;  %463 = vmatpush1.msk.msra.mxu0 %vm154_vm1, %v171_v19 }
  0x9e   :  { %v356_v25 = vmul.f32 %v314_v23, %v59_v13  ;;  %v357_v26 = vmul.f32 %v315_v24, %v60_v14  ;;  %v54_v24 = vld [vmem:[#allocation6 + $0x18] sm:$0xff] }
  0xa0   :  { %v105_v27 = vpop.permute.xlu1 %104  ;;  %v103_v28 = vpop.permute.xlu0 %102  ;;  %465 = vmatprep.subr.msk.mxu1 %vm154_vm1, %v357_v26 }
  0xa1   :  { %v107_v31 = vsel %vm106_vm2, %v103_v28, %v105_v27  ;;  %v108_v32 = vsel %vm106_vm2, %v105_v27, %v103_v28  ;;  %466 = vmatpush1.msk.msra.mxu1 %vm154_vm1, %v356_v25  ;;  %v53_v25 = vld [vmem:[#allocation6 + $0x10] sm:$0xff] }
  0xa2   :  { %v145_v33 = vrot.slane %v108_v32, 4  ;;  %v144_v34 = vrot.slane %v107_v31, 4 }
  0xa4   :  { %v112_v37 = vpop.permute.xlu1 %111  ;;  %v110_v38 = vpop.permute.xlu0 %109  ;;  %v160_v46 = vsel %vm154_vm1, %v622_v3, %v145_v33  ;;  %v159_v50 = vsel %vm154_vm1, %v610_v1, %v144_v34 }
  0xa5   :  { %v114_v41 = vsel %vm113_vm4, %v110_v38, %v112_v37  ;;  %v115_v42 = vsel %vm113_vm4, %v112_v37, %v110_v38  ;;  %v168_v57 = vmul.f32 %v160_v46, %v56_v45  ;;  %v167_v59 = vmul.f32 %v159_v50, %v55_v49 }
  0xa6   :  { %v161_v43 = vsel %vm154_vm1, %v114_v41, %v150_v35  ;;  %v162_v44 = vsel %vm154_vm1, %v115_v42, %v151_v36 }
  0xa7   :  { %v170_v47 = vmul.f32 %v162_v44, %v58_v39  ;;  %v169_v48 = vmul.f32 %v161_v43, %v57_v40 }
  0xa8   :  { %v295_v52 = vpop.permute.xlu1 %294  ;;  %v293_v53 = vpop.permute.xlu0 %292 }
  0xa9   :  { %v296_v55 = vsel %vm106_vm2, %v293_v53, %v295_v52  ;;  %v297_v56 = vsel %vm106_vm2, %v295_v52, %v293_v53  ;;  %207 = vmatprep.subr.mxu0 %v170_v47  ;;  %v52_v52 = vld [vmem:[#allocation6 + $0x8] sm:$0xff]  ;;  %v51_v53 = vld [vmem:[#allocation6] sm:$0xff] }
  0xaa   :  { %v331_v58 = vrot.slane %v297_v56, 4  ;;  %208 = vmatpush1.msra.mxu0 %v169_v48  ;;  %v330_v60 = vrot.slane %v296_v55, 4 }
  0xab   :  { %209 = vmatprep.subr.mxu0 %v168_v57 }
  0xac   :  { %v301_v63 = vpop.permute.xlu1 %300  ;;  %v299_v1 = vpop.permute.xlu0 %298  ;;  %210 = vmatpush1.msra.mxu0 %v167_v59  ;;  %v345_v7 = vsel %vm154_vm1, %v616_v2, %v331_v58  ;;  %v344_v11 = vsel %vm154_vm1, %v608_v0, %v330_v60 }
  0xad   :  { %v302_v3 = vsel %vm113_vm4, %v299_v1, %v301_v63  ;;  %v303_v4 = vsel %vm113_vm4, %v301_v63, %v299_v1  ;;  %v353_v14 = vmul.f32 %v345_v7, %v56_v45  ;;  %v352_v15 = vmul.f32 %v344_v11, %v55_v49 }
  0xae   :  { %v346_v5 = vsel %vm154_vm1, %v302_v3, %v336_v61  ;;  %v347_v6 = vsel %vm154_vm1, %v303_v4, %v337_v62  ;;  %v50_v4 = vld [vmem:[%s762_s1] sm:$0xff] }
  0xaf   :  { %v355_v8 = vmul.f32 %v347_v6, %v58_v39  ;;  %v354_v9 = vmul.f32 %v346_v5, %v57_v40 }
  0xb0   :  { %v98_v12 = vpop.permute.xlu1 %97  ;;  %v96_v13 = vpop.permute.xlu0 %95 }
  0xb1   :  { %388 = vmatprep.subr.mxu1 %v355_v8  ;;  %v100_v2 = vsel %vm99_vm5, %v96_v13, %v98_v12  ;;  %v101_v0 = vsel %vm99_vm5, %v98_v12, %v96_v13 }
  0xb2   :  { %389 = vmatpush1.msra.mxu1 %v354_v9  ;;  %v138_v20 = vrot.slane %v101_v0, 4  ;;  %v139_v21 = vrot.slane %v100_v2, 4 }
  0xb3   :  { %390 = vmatprep.subr.mxu1 %v353_v14  ;;  %v256_v14 = vstv %s765_s4  ;;  %s527_s4 = scalar_lea.vmem %s450_s17, 512 }
  0xb4   :  { %v289_v16 = vpop.permute.xlu1 %288  ;;  %v287_v17 = vpop.permute.xlu0 %286  ;;  %391 = vmatpush1.msra.mxu1 %v352_v15  ;;  %p528_p10 = scmp.ne.s32.totalorder %s450_s17, %s527_s4  ;;  %p533_p12 = scmp.lt.s32.totalorder %s527_s4, %s527_s4 }
  0xb5   :  { %v290_v34 = vsel %vm99_vm5, %v287_v17, %v289_v16  ;;  %v291_v35 = vsel %vm99_vm5, %v289_v16, %v287_v17 }
  0xb6   :  { %v324_v36 = vrot.slane %v291_v35, 4  ;;  %v325_v37 = vrot.slane %v290_v34, 4  ;;  %p534_p13 = por %p533_p12, %p532_p11 }
  0xb8   :  { %v84_v18 = vpop.permute.xlu1 %83  ;;  %v82_v19 = vpop.permute.xlu0 %81  ;;  %p535_p0 = pnand %p534_p13, %p528_p10 }
  0xb9   :  { %v86_v40 = vsel %vm85_vm7, %v82_v19, %v84_v18  ;;  %v87_v41 = vsel %vm85_vm7, %v84_v18, %v82_v19 }
  0xba   :  { %v132_v48 = vrot.slane %v87_v41, 4  ;;  %v133_v49 = vrot.slane %v86_v40, 4 }
  0xbc   :  { %v91_v22 = vpop.permute.xlu1 %90  ;;  %v89_v23 = vpop.permute.xlu0 %88 }
  0xbd   :  { %v93_v26 = vsel %vm92_vm6, %v89_v23, %v91_v22  ;;  %v94_v27 = vsel %vm92_vm6, %v91_v22, %v89_v23 }
  0xbe   :  { %v157_v28 = vsel %vm154_vm1, %v94_v27, %v138_v20  ;;  %v158_v29 = vsel %vm154_vm1, %v93_v26, %v139_v21 }
  0xbf   :  { %v166_v30 = vmul.f32 %v158_v29, %v54_v24  ;;  %v165_v31 = vmul.f32 %v157_v28, %v53_v25 }
  0xc0   :  { %v277_v32 = vpop.permute.xlu1 %276  ;;  %v275_v33 = vpop.permute.xlu0 %274 }
  0xc1   :  { %211 = vmatprep.subr.mxu0 %v166_v30  ;;  %v278_v54 = vsel %vm85_vm7, %v275_v33, %v277_v32  ;;  %v279_v55 = vsel %vm85_vm7, %v277_v32, %v275_v33 }
  0xc2   :  { %212 = vmatpush1.msra.mxu0 %v165_v31  ;;  %v318_v62 = vrot.slane %v279_v55, 4  ;;  %v319_v63 = vrot.slane %v278_v54, 4 }
  0xc4   :  { %v283_v38 = vpop.permute.xlu1 %282  ;;  %v281_v39 = vpop.permute.xlu0 %280 }
  0xc5   :  { %v284_v42 = vsel %vm92_vm6, %v281_v39, %v283_v38  ;;  %v285_v43 = vsel %vm92_vm6, %v283_v38, %v281_v39 }
  0xc6   :  { %v342_v44 = vsel %vm154_vm1, %v285_v43, %v324_v36  ;;  %v343_v45 = vsel %vm154_vm1, %v284_v42, %v325_v37 }
  0xc7   :  { %v351_v46 = vmul.f32 %v343_v45, %v54_v24  ;;  %v350_v47 = vmul.f32 %v342_v44, %v53_v25 }
  0xc8   :  { %v75_v50 = vpop.permute.xlu1 %74  ;;  %v73_v51 = vpop.permute.xlu0 %72 }
  0xc9   :  { %v79_v56 = vsel %vm78_vm8, %v73_v51, %v75_v50  ;;  %v80_v57 = vsel %vm78_vm8, %v75_v50, %v73_v51  ;;  %392 = vmatprep.subr.mxu1 %v351_v46 }
  0xca   :  { %v155_v58 = vsel %vm154_vm1, %v80_v57, %v132_v48  ;;  %v156_v59 = vsel %vm154_vm1, %v79_v56, %v133_v49  ;;  %393 = vmatpush1.msra.mxu1 %v350_v47 }
  0xcb   :  { %v164_v60 = vmul.f32 %v156_v59, %v52_v52  ;;  %v163_v61 = vmul.f32 %v155_v58, %v51_v53 }
  0xcc   :  { %v271_v1 = vpop.permute.xlu1 %270  ;;  %v269_v3 = vpop.permute.xlu0 %268 }
  0xcd   :  { %v272_v5 = vsel %vm78_vm8, %v269_v3, %v271_v1  ;;  %v273_v6 = vsel %vm78_vm8, %v271_v1, %v269_v3  ;;  %213 = vmatprep.subr.mxu0 %v164_v60 }
  0xce   :  { %v340_v7 = vsel %vm154_vm1, %v273_v6, %v318_v62  ;;  %v341_v8 = vsel %vm154_vm1, %v272_v5, %v319_v63  ;;  %214 = vmatpush1.msra.mxu0 %v163_v61 }
  0xcf   :  { %464 = vmatmul.mubr.msk.f32.vlgmr.msra.gmra.mxu0 %vm173_vm9, %v50_v4  ;;  %v349_v9 = vmul.f32 %v341_v8, %v52_v52  ;;  %v348_v11 = vmul.f32 %v340_v7, %v51_v53 }
  0xd1   :  { %394 = vmatprep.subr.mxu1 %v349_v9 }
  0xd2   :  { %395 = vmatpush1.msra.mxu1 %v348_v11 }
  0xd3   :  { %467 = vmatmul.mubr.msk.f32.vlgmr.msra.gmra.mxu1 %vm173_vm9, %v50_v4 }
  0xd9   :  { %v65_v12 = vpop.permute.xlu0 %64 }
 0x18f   :  { %v249_v13 = vpop.f32.mrf.mxu0 }
 0x190   :  { %v250_v10 = vadd.f32 %v249_v13, %v65_v12 }
 0x191   :  { %v251_v15 = vpop.f32.mrf.mxu0 }
 0x192   :  { %vm254_vm10 = vcmp.gt.f32.partialorder %v250_v10, 0.0  ;;  %v257_v16 = vmul.f32 %v256_v14, %v250_v10  ;;  %v252_v17 = vadd.f32 %v251_v15, %v65_v12 }
 0x193   :  { %v430_v18 = vpop.f32.mrf.mxu1 }
 0x194   :  { %v259_v19 = vsel %vm254_vm10, %v250_v10, %v257_v16  ;;  %vm255_vm11 = vcmp.gt.f32.partialorder %v252_v17, 0.0  ;;  %v258_v2 = vmul.f32 %v256_v14, %v252_v17  ;;  %v431_v0 = vadd.f32 %v430_v18, %v65_v12 }
 0x195   :  { %261 = vst [vmem:[#allocation8] sm:$0xff] %v259_v19  ;;  %v432_v20 = vpop.f32.mrf.mxu1 }
 0x196   :  { %v260_v21 = vsel %vm255_vm11, %v252_v17, %v258_v2  ;;  %vm435_vm12 = vcmp.gt.f32.partialorder %v431_v0, 0.0  ;;  %v437_v22 = vmul.f32 %v431_v0, %v256_v14  ;;  %v433_v23 = vadd.f32 %v432_v20, %v65_v12 }
 0x197   :  { %262 = vst [vmem:[#allocation8 + $0x8] sm:$0xff] %v260_v21 }
 0x198   :  { %v439_v24 = vsel %vm435_vm12, %v431_v0, %v437_v22  ;;  %vm436_vm13 = vcmp.gt.f32.partialorder %v433_v23, 0.0  ;;  %v438_v25 = vmul.f32 %v433_v23, %v256_v14 }
 0x199   :  { %442 = vst [vmem:[#allocation8 + $0x10] sm:$0xff] %v439_v24 }
 0x19a   :  { %v440_v26 = vsel %vm436_vm13, %v433_v23, %v438_v25 }
 0x19b   :  { %443 = vst [vmem:[#allocation8 + $0x18] sm:$0xff] %v440_v26 }
 0x19c   :  { %538 = shalt.err (!%p535_p0)
}
 0x19d   :  { %455 = dma.vmem_to_hbm [thread:$0]  %s450_s17, 512, %s766_s5, [#allocation5], %s557_s28, %s557_s28, %s558_s29  }
 0x19e   :  { %551 = dma.done.wait [#allocation5], 512  }
 0x19f   :  { %552 = vsyncadd [#allocation5], 4294966784 }
 0x1a0   :  { %459 = vsyncpa [#allocation4], 1 }
 0x1a1   :  { %460 = vsyncpa [#allocation7], 1 }
 0x1a2   :  { %461 = vsyncpa [#allocation5], 1 }

</bundles_post_ra>
